<compile_context>
chip_gen: v5e
topology: v5e:2x2
jax: 0.10.0
libtpu: 0.0.40
codegen_flags: <defaults>
</compile_context>

<pallas_src>
import numpy as np
import jax
import jax.numpy as jnp
from jax.experimental import pallas as pl
from jax.experimental.pallas import tpu as pltpu

# ----------------------------- configuration -------------------------------
GRAPH_DEG = 4                    # nodes per "block" (rows max-pooled together)
DEPTH = 2                        # message-passing depth
NODE_DIM = 32                    # hidden width
DIRECTION = "2FB2"               # per edge-type (2,3,4,5): 'F', 'B', or '2' (both)
NUM_GRAPHS = 2
BLOCKS_PER_GRAPH = 2
NODES_PER_GRAPH = BLOCKS_PER_GRAPH * GRAPH_DEG       # 8
NUM_BLOCKS = NUM_GRAPHS * BLOCKS_PER_GRAPH           # 4
NUM_NODES = NUM_GRAPHS * NODES_PER_GRAPH             # 16
T = 1.0

OUT_SUB, OUT_LANE = 8, 128       # lane-dense output tile per graph


def active_convs(direction):
    """(edge_type, is_backward) in the exact order GCN_single accumulates them."""
    convs = [(1, False)]
    for idx, et in enumerate((2, 3, 4, 5)):
        d = direction[idx]
        if d in ("F", "2"):
            convs.append((et, False))
        if d in ("B", "2"):
            convs.append((et, True))
    return convs


CONVS = active_convs(DIRECTION)
NUM_CONVS = len(CONVS)

# ----------------------- packed-parameter row layout ------------------------
# One (PARAM_ROWS, NODE_DIM) f32 slab instead of 8 tiny inputs.
W1_ROW = 0                       # rows [0, NODE_DIM): out1 weight (right-multiplier)
WN_ROW = NODE_DIM + 0            # node_linear weight (row of NODE_DIM)
BN_ROW = NODE_DIM + 1            # node_linear bias
BSUM_ROW = NODE_DIM + 2          # sum of all conv biases (added once per depth)
B1_ROW = NODE_DIM + 3            # out1 bias
W2_ROW = NODE_DIM + 4            # out2 weight / T  (as a lane row)
B2_ROW = NODE_DIM + 5            # out2 bias / T    (broadcast across lanes)
PARAM_ROWS = NODE_DIM + 8        # pad sublane count to a multiple of 8


# ------------------------------- glue: graph -------------------------------
def dense_gcn_adjacency(src, dst, num_nodes):
    """PyG GCNConv normalization, dense: A_hat[i,j] = d_i^-1/2 d_j^-1/2 for edge j->i,
    with self loops added; deg = in-degree (incl. self loop)."""
    A = np.zeros((num_nodes, num_nodes), np.float32)
    if len(src):
        np.add.at(A, (dst, src), 1.0)
    A[np.arange(num_nodes), np.arange(num_nodes)] += 1.0   # self loops
    deg = A.sum(axis=1)
    dinv = np.where(deg > 0, deg ** -0.5, 0.0).astype(np.float32)
    return (dinv[:, None] * A * dinv[None, :]).astype(np.float32)


def build_adjacencies_full(edge_index, edge_types):
    """(C, N, N) full-batch adjacencies — used only by the numpy reference."""
    src_all, dst_all = np.asarray(edge_index[0]), np.asarray(edge_index[1])
    et = np.asarray(edge_types)
    adjs = []
    for etype, backward in CONVS:
        m = et == etype
        s, d = src_all[m], dst_all[m]
        if backward:            # edge_index_b[[1,0]] = edge_index  <=> swap rows
            s, d = d, s
        adjs.append(dense_gcn_adjacency(s, d, NUM_NODES))
    return np.stack(adjs, axis=0)


def build_adjacencies_per_graph(edge_index, edge_types):
    """(G, C*Npg, Npg): per graph, the vertical stack of per-conv normalized dense
    adjacencies. Exact, because PyG batching never carries cross-graph edges (the
    batched adjacency is block-diagonal)."""
    src_all, dst_all = np.asarray(edge_index[0]), np.asarray(edge_index[1])
    et = np.asarray(edge_types)
    npg = NODES_PER_GRAPH
    out = np.zeros((NUM_GRAPHS, NUM_CONVS * npg, npg), np.float32)
    for g in range(NUM_GRAPHS):
        lo, hi = g * npg, (g + 1) * npg
        in_g = (src_all >= lo) & (src_all < hi) & (dst_all >= lo) & (dst_all < hi)
        for ci, (etype, backward) in enumerate(CONVS):
            m = in_g & (et == etype)
            s, d = src_all[m] - lo, dst_all[m] - lo
            if backward:
                s, d = d, s
            out[g, ci * npg:(ci + 1) * npg] = dense_gcn_adjacency(s, d, npg)
    return out


def pack_params(wn, bn, conv_b, w1, b1, w2, b2, temperature):
    p = np.zeros((PARAM_ROWS, NODE_DIM), np.float32)
    p[W1_ROW:W1_ROW + NODE_DIM] = np.asarray(w1)
    p[WN_ROW] = np.asarray(wn)[0]
    p[BN_ROW] = np.asarray(bn)[0]
    p[BSUM_ROW] = np.asarray(conv_b).sum(axis=0)[0]          # Σ_c b_c
    p[B1_ROW] = np.asarray(b1)[0]
    p[W2_ROW] = np.asarray(w2)[:, 0] / temperature           # fold 1/T
    p[B2_ROW] = np.asarray(b2)[0, 0] / temperature           # fold 1/T
    return p


# ------------------------------ Pallas kernel ------------------------------
def gcn_multi_kernel(x_ref, a_ref, w3_ref, params_ref, out_ref):
    # unpack the packed parameter slab (static row slices of a single VMEM input)
    w1 = params_ref[W1_ROW:W1_ROW + NODE_DIM, :]          # (D, D)
    wn = params_ref[WN_ROW:WN_ROW + 1, :]                 # (1, D)
    bn = params_ref[BN_ROW:BN_ROW + 1, :]                 # (1, D)
    bsum = params_ref[BSUM_ROW:BSUM_ROW + 1, :]           # (1, D)
    b1 = params_ref[B1_ROW:B1_ROW + 1, :]                 # (1, D)
    w2row = params_ref[W2_ROW:W2_ROW + 1, :]              # (1, D)  (already / T)
    b2 = params_ref[B2_ROW:B2_ROW + 1, 0:1]               # (1, 1)  (already / T)

    # node_linear: rank-1 (Npg,1)x(1,D) product done on the VPU (no K=1 MXU call)
    x = x_ref[0] * wn + bn                                # (Npg, D)

    a_tall = a_ref[0]                                     # (C*Npg, Npg) vstack of A_c
    w3 = w3_ref[...]                                      # (C, D, D)

    # depth iterations: one fused MXU call for all A_c (K=Npg), one batched einsum
    # for the per-conv W_c, a single bias add per depth.
    for _ in range(DEPTH):
        ax = jnp.dot(a_tall, x, preferred_element_type=jnp.float32)       # (C*Npg, D)
        ax3 = ax.reshape(NUM_CONVS, NODES_PER_GRAPH, NODE_DIM)            # major-dim split
        prod = jnp.einsum("cnk,ckd->cnd", ax3, w3,
                          preferred_element_type=jnp.float32)             # (C, Npg, D)
        x = jnp.maximum(prod.sum(axis=0) + bsum, 0.0)                     # (Npg, D)

    # per-block max-pool via reshape (no slice+concat relayouts)
    xxx = jnp.max(x.reshape(BLOCKS_PER_GRAPH, GRAPH_DEG, NODE_DIM), axis=1)   # (Bpg, D)

    # out1 -> relu -> out2 (lane reduction instead of a Dx1 MXU call) -> sigmoid(/T)
    h = jnp.maximum(jnp.dot(xxx, w1, preferred_element_type=jnp.float32) + b1, 0.0)
    y = jnp.sum(h * w2row, axis=-1, keepdims=True) + b2                   # (Bpg, 1)
    s = jax.nn.sigmoid(y)

    # per-graph sum over its contiguous blocks (torch.unique on a sorted data.batch)
    g_sum = jnp.sum(s, axis=0, keepdims=True)                             # (1, 1)

    # lane-dense unmasked store; wrapper extracts element [0, 0] of the tile
    out_ref[...] = jnp.broadcast_to(g_sum, (OUT_SUB, OUT_LANE))


def gcn_multi_forward(x3, a_tall3, conv_w, params):
    npg = NODES_PER_GRAPH
    out = pl.pallas_call(
        gcn_multi_kernel,
        out_shape=jax.ShapeDtypeStruct((NUM_GRAPHS * OUT_SUB, OUT_LANE), jnp.float32),
        grid_spec=pltpu.PrefetchScalarGridSpec(
            num_scalar_prefetch=0,
            grid=(NUM_GRAPHS,),
            in_specs=[
                # per-graph node features (G, Npg, 1)
                pl.BlockSpec((1, npg, 1), lambda g: (g, 0, 0)),
                # per-graph stacked normalized adjacencies (G, C*Npg, Npg)
                pl.BlockSpec((1, NUM_CONVS * npg, npg), lambda g: (g, 0, 0)),
                # shared conv weights (C, D, D) — same block every step (no re-DMA)
                pl.BlockSpec((NUM_CONVS, NODE_DIM, NODE_DIM), lambda g: (0, 0, 0)),
                # shared packed parameter slab
                pl.BlockSpec((PARAM_ROWS, NODE_DIM), lambda g: (0, 0)),
            ],
            out_specs=pl.BlockSpec((OUT_SUB, OUT_LANE), lambda g: (g, 0)),
        ),
        compiler_params=pltpu.CompilerParams(
            dimension_semantics=("parallel",)),
    )(x3, a_tall3, conv_w, params)
    # scalar per graph lives at [g*OUT_SUB, 0]
    return out.reshape(NUM_GRAPHS, OUT_SUB, OUT_LANE)[:, 0, 0]


# -------------------------- pure-numpy reference (PyTorch order) ------------
def reference(x, adjs, conv_w, conv_b, wn, bn, w1, b1, w2, b2, seg, temperature):
    x = x @ wn + bn
    for _ in range(DEPTH):
        xs = np.zeros_like(x)
        for c in range(NUM_CONVS):
            xs = xs + adjs[c] @ (x @ conv_w[c]) + conv_b[c]
        x = np.maximum(xs, 0.0)
    xxx = x.reshape(NUM_BLOCKS, GRAPH_DEG, NODE_DIM).max(axis=1)
    h = np.maximum(xxx @ w1 + b1, 0.0)
    y = h @ w2 + b2
    s = 1.0 / (1.0 + np.exp(-y / temperature))
    return seg @ s


# --------------------------------- main -------------------------------------
if __name__ == "__main__":
    key = jax.random.PRNGKey(0)
    keys = jax.random.split(key, 16)

    # deterministic synthetic graph (edges kept within each graph of the batch,
    # exactly as PyG batching guarantees)
    x_nodes = jax.random.normal(keys[0], (NUM_NODES, 1), dtype=jnp.float32)
    e_per_graph = 20
    srcs, dsts = [], []
    for g in range(NUM_GRAPHS):
        s = jax.random.randint(keys[1 + g], (e_per_graph,), 0, NODES_PER_GRAPH)
        d = jax.random.randint(keys[3 + g], (e_per_graph,), 0, NODES_PER_GRAPH)
        srcs.append(np.asarray(s) + g * NODES_PER_GRAPH)
        dsts.append(np.asarray(d) + g * NODES_PER_GRAPH)
    edge_index = np.stack([np.concatenate(srcs), np.concatenate(dsts)], axis=0)
    edge_types = np.asarray(
        jax.random.randint(keys[5], (edge_index.shape[1],), 1, 6))
    batch = np.repeat(np.arange(NUM_GRAPHS), NODES_PER_GRAPH)        # data.batch
    batch_blocks = batch[::GRAPH_DEG]                                # batch[::graph_deg]

    # segment one-hot, used only by the numpy reference (kernel uses static reshape+sum)
    seg = (batch_blocks[None, :] == np.arange(NUM_GRAPHS)[:, None]).astype(np.float32)

    adjs_full = build_adjacencies_full(edge_index, edge_types)       # (C, N, N) for ref
    a_tall3 = build_adjacencies_per_graph(edge_index, edge_types)    # (G, C*Npg, Npg)

    # deterministic parameter init (xavier-uniform weights, zero biases)
    def xavier(k, fan_in, fan_out, shape):
        bound = np.sqrt(6.0 / (fan_in + fan_out))
        return jax.random.uniform(k, shape, jnp.float32, -bound, bound)

    wkeys = jax.random.split(keys[6], NUM_CONVS + 3)
    wn = xavier(wkeys[0], 1, NODE_DIM, (1, NODE_DIM))                # node_linear^T
    bn = jnp.zeros((1, NODE_DIM), jnp.float32)
    conv_w = jnp.stack([xavier(wkeys[1 + c], NODE_DIM, NODE_DIM,
                               (NODE_DIM, NODE_DIM)) for c in range(NUM_CONVS)])
    conv_b = jnp.zeros((NUM_CONVS, 1, NODE_DIM), jnp.float32)
    w1 = xavier(wkeys[NUM_CONVS + 1], NODE_DIM, NODE_DIM, (NODE_DIM, NODE_DIM))
    b1 = jnp.zeros((1, NODE_DIM), jnp.float32)
    w2 = xavier(wkeys[NUM_CONVS + 2], NODE_DIM, 1, (NODE_DIM, 1))
    b2 = jnp.zeros((1, 1), jnp.float32)

    params = pack_params(wn, bn, conv_b, w1, b1, w2, b2, T)

    x3 = np.asarray(x_nodes).reshape(NUM_GRAPHS, NODES_PER_GRAPH, 1)

    out = gcn_multi_forward(jnp.asarray(x3), jnp.asarray(a_tall3),
                            jnp.asarray(conv_w), jnp.asarray(params))
    out = jax.block_until_ready(out)
    result = np.asarray(out).reshape(-1)                             # (NUM_GRAPHS,)

    ref = reference(np.asarray(x_nodes), adjs_full, np.asarray(conv_w),
                    np.asarray(conv_b), np.asarray(wn), np.asarray(bn),
                    np.asarray(w1), np.asarray(b1), np.asarray(w2),
                    np.asarray(b2), seg, T).reshape(-1)

    assert np.allclose(result, ref, rtol=1e-4, atol=5e-5), (result, ref)
    print("KERNEL_OK")
</pallas_src>

<mosaic_0001>
module attributes {stable_mosaic.version = 11 : i64} {
  func.func @gcn_multi_kernel(%arg0: i32, %arg1: memref<1x8x1xf32, #tpu.memory_space<vmem>>, %arg2: memref<1x56x8xf32, #tpu.memory_space<vmem>>, %arg3: memref<7x32x32xf32, #tpu.memory_space<vmem>>, %arg4: memref<40x32xf32, #tpu.memory_space<vmem>>, %arg5: memref<8x128xf32, #tpu.memory_space<vmem>>) attributes {dimension_semantics = [#tpu.dimension_semantics<parallel>], iteration_bounds = array<i64: 2>, scalar_prefetch = 0 : i64, scratch_operands = 0 : i64, tpu.core_type = #tpu.core_type<tc>, window_params = [{transform_indices = @transform_0, window_bounds = array<i64: 1, 8, 1>}, {transform_indices = @transform_1, window_bounds = array<i64: 1, 56, 8>}, {pipeline_mode = #tpu.pipeline_mode<synchronous>, transform_indices = @transform_2, window_bounds = array<i64: 7, 32, 32>}, {pipeline_mode = #tpu.pipeline_mode<synchronous>, transform_indices = @transform_3, window_bounds = array<i64: 40, 32>}, {transform_indices = @transform_4, window_bounds = array<i64: 8, 128>}]} {
    %c0 = arith.constant 0 : index
    %c0_0 = arith.constant 0 : index
    %0 = vector.load %arg4[%c0, %c0_0] : memref<40x32xf32, #tpu.memory_space<vmem>>, vector<32x32xf32>
    %c32 = arith.constant 32 : index
    %c0_1 = arith.constant 0 : index
    %1 = vector.load %arg4[%c32, %c0_1] : memref<40x32xf32, #tpu.memory_space<vmem>>, vector<1x32xf32>
    %c33 = arith.constant 33 : index
    %c0_2 = arith.constant 0 : index
    %2 = vector.load %arg4[%c33, %c0_2] : memref<40x32xf32, #tpu.memory_space<vmem>>, vector<1x32xf32>
    %c34 = arith.constant 34 : index
    %c0_3 = arith.constant 0 : index
    %3 = vector.load %arg4[%c34, %c0_3] : memref<40x32xf32, #tpu.memory_space<vmem>>, vector<1x32xf32>
    %c35 = arith.constant 35 : index
    %c0_4 = arith.constant 0 : index
    %4 = vector.load %arg4[%c35, %c0_4] : memref<40x32xf32, #tpu.memory_space<vmem>>, vector<1x32xf32>
    %c36 = arith.constant 36 : index
    %c0_5 = arith.constant 0 : index
    %5 = vector.load %arg4[%c36, %c0_5] : memref<40x32xf32, #tpu.memory_space<vmem>>, vector<1x32xf32>
    %c37 = arith.constant 37 : index
    %c0_6 = arith.constant 0 : index
    %6 = vector.load %arg4[%c37, %c0_6] : memref<40x32xf32, #tpu.memory_space<vmem>>, vector<1x1xf32>
    %c0_7 = arith.constant 0 : index
    %c0_8 = arith.constant 0 : index
    %c0_9 = arith.constant 0 : index
    %7 = vector.load %arg1[%c0_7, %c0_8, %c0_9] : memref<1x8x1xf32, #tpu.memory_space<vmem>>, vector<1x8x1xf32>
    %8 = vector.shape_cast %7 : vector<1x8x1xf32> to vector<8x1xf32>
    %9 = vector.broadcast %8 : vector<8x1xf32> to vector<8x32xf32>
    %10 = vector.broadcast %1 : vector<1x32xf32> to vector<8x32xf32>
    %11 = arith.mulf %9, %10 : vector<8x32xf32>
    %12 = vector.broadcast %2 : vector<1x32xf32> to vector<8x32xf32>
    %13 = arith.addf %11, %12 : vector<8x32xf32>
    %c0_10 = arith.constant 0 : index
    %c0_11 = arith.constant 0 : index
    %c0_12 = arith.constant 0 : index
    %14 = vector.load %arg2[%c0_10, %c0_11, %c0_12] : memref<1x56x8xf32, #tpu.memory_space<vmem>>, vector<1x56x8xf32>
    %15 = vector.shape_cast %14 : vector<1x56x8xf32> to vector<56x8xf32>
    %c0_13 = arith.constant 0 : index
    %c0_14 = arith.constant 0 : index
    %c0_15 = arith.constant 0 : index
    %16 = vector.load %arg3[%c0_13, %c0_14, %c0_15] : memref<7x32x32xf32, #tpu.memory_space<vmem>>, vector<7x32x32xf32>
    %cst = arith.constant dense<0.000000e+00> : vector<56x32xf32>
    %17 = tpu.matmul %15, %13, %cst {dimension_numbers = #tpu.dot_dimension_numbers<[1], [0], [0], [1], [0, 0, 1, 1], [], []>} : vector<56x8xf32>, vector<8x32xf32>, vector<56x32xf32> -> vector<56x32xf32>
    %18 = vector.shape_cast %17 : vector<56x32xf32> to vector<7x8x32xf32>
    "tpu.trace_start"() <{level = 10 : i32, message = "cnk,ckd->cnd"}> : () -> ()
    %cst_16 = arith.constant dense<0.000000e+00> : vector<7x8x32xf32>
    %19 = tpu.matmul %18, %16, %cst_16 {dimension_numbers = #tpu.dot_dimension_numbers<[2], [1], [1], [2], [0, 0, 0, 1, 1, 2], [0], [0]>} : vector<7x8x32xf32>, vector<7x32x32xf32>, vector<7x8x32xf32> -> vector<7x8x32xf32>
    "tpu.trace_stop"() : () -> ()
    %cst_17 = arith.constant dense<0.000000e+00> : vector<8x32xf32>
    %20 = vector.multi_reduction <add>, %19, %cst_17 [0] : vector<7x8x32xf32> to vector<8x32xf32>
    %21 = vector.broadcast %3 : vector<1x32xf32> to vector<8x32xf32>
    %22 = arith.addf %20, %21 : vector<8x32xf32>
    %cst_18 = arith.constant 0.000000e+00 : f32
    %23 = vector.broadcast %cst_18 : f32 to vector<8x32xf32>
    %24 = arith.maximumf %22, %23 : vector<8x32xf32>
    %cst_19 = arith.constant dense<0.000000e+00> : vector<56x32xf32>
    %25 = tpu.matmul %15, %24, %cst_19 {dimension_numbers = #tpu.dot_dimension_numbers<[1], [0], [0], [1], [0, 0, 1, 1], [], []>} : vector<56x8xf32>, vector<8x32xf32>, vector<56x32xf32> -> vector<56x32xf32>
    %26 = vector.shape_cast %25 : vector<56x32xf32> to vector<7x8x32xf32>
    "tpu.trace_start"() <{level = 10 : i32, message = "cnk,ckd->cnd"}> : () -> ()
    %cst_20 = arith.constant dense<0.000000e+00> : vector<7x8x32xf32>
    %27 = tpu.matmul %26, %16, %cst_20 {dimension_numbers = #tpu.dot_dimension_numbers<[2], [1], [1], [2], [0, 0, 0, 1, 1, 2], [0], [0]>} : vector<7x8x32xf32>, vector<7x32x32xf32>, vector<7x8x32xf32> -> vector<7x8x32xf32>
    "tpu.trace_stop"() : () -> ()
    %cst_21 = arith.constant dense<0.000000e+00> : vector<8x32xf32>
    %28 = vector.multi_reduction <add>, %27, %cst_21 [0] : vector<7x8x32xf32> to vector<8x32xf32>
    %29 = vector.broadcast %3 : vector<1x32xf32> to vector<8x32xf32>
    %30 = arith.addf %28, %29 : vector<8x32xf32>
    %cst_22 = arith.constant 0.000000e+00 : f32
    %31 = vector.broadcast %cst_22 : f32 to vector<8x32xf32>
    %32 = arith.maximumf %30, %31 : vector<8x32xf32>
    %33 = vector.shape_cast %32 : vector<8x32xf32> to vector<2x4x32xf32>
    %cst_23 = arith.constant dense<0xFF800000> : vector<2x32xf32>
    %34 = vector.multi_reduction <maximumf>, %33, %cst_23 [1] : vector<2x4x32xf32> to vector<2x32xf32>
    %cst_24 = arith.constant dense<0.000000e+00> : vector<2x32xf32>
    %35 = tpu.matmul %34, %0, %cst_24 {dimension_numbers = #tpu.dot_dimension_numbers<[1], [0], [0], [1], [0, 0, 1, 1], [], []>} : vector<2x32xf32>, vector<32x32xf32>, vector<2x32xf32> -> vector<2x32xf32>
    %36 = vector.broadcast %4 : vector<1x32xf32> to vector<2x32xf32>
    %37 = arith.addf %35, %36 : vector<2x32xf32>
    %cst_25 = arith.constant 0.000000e+00 : f32
    %38 = vector.broadcast %cst_25 : f32 to vector<2x32xf32>
    %39 = arith.maximumf %37, %38 : vector<2x32xf32>
    %40 = vector.broadcast %5 : vector<1x32xf32> to vector<2x32xf32>
    %41 = arith.mulf %39, %40 : vector<2x32xf32>
    %cst_26 = arith.constant dense<0.000000e+00> : vector<2xf32>
    %42 = vector.multi_reduction <add>, %41, %cst_26 [1] : vector<2x32xf32> to vector<2xf32>
    %43 = vector.shape_cast %42 : vector<2xf32> to vector<2x1xf32>
    %44 = vector.broadcast %6 : vector<1x1xf32> to vector<2x1xf32>
    %45 = arith.addf %43, %44 : vector<2x1xf32>
    %46 = arith.negf %45 : vector<2x1xf32>
    %47 = math.exp %46 : vector<2x1xf32>
    %cst_27 = arith.constant 1.000000e+00 : f32
    %48 = vector.broadcast %cst_27 : f32 to vector<2x1xf32>
    %49 = arith.addf %48, %47 : vector<2x1xf32>
    %50 = arith.divf %48, %49 : vector<2x1xf32>
    %cst_28 = arith.constant dense<0.000000e+00> : vector<1xf32>
    %51 = vector.multi_reduction <add>, %50, %cst_28 [0] : vector<2x1xf32> to vector<1xf32>
    %52 = vector.shape_cast %51 : vector<1xf32> to vector<1x1xf32>
    %53 = vector.shape_cast %52 : vector<1x1xf32> to vector<1x1xf32>
    %54 = vector.broadcast %53 : vector<1x1xf32> to vector<8x128xf32>
    %c0_29 = arith.constant 0 : index
    %c0_30 = arith.constant 0 : index
    %55 = vector.load %arg5[%c0_29, %c0_30] : memref<8x128xf32, #tpu.memory_space<vmem>>, vector<8x128xf32>
    tpu.vector_store %arg5[%c0_29, %c0_30], %54 {strides = array<i32>} : memref<8x128xf32, #tpu.memory_space<vmem>>, vector<8x128xf32>,
    return
  }
  func.func @transform_0(%arg0: i32) -> (i32, i32, i32) {
    %c0_i32 = arith.constant 0 : i32
    %c0_i32_0 = arith.constant 0 : i32
    %c0_i32_1 = arith.constant 0 : i32
    return %arg0, %c0_i32, %c0_i32_0 : i32, i32, i32
  }
  func.func @transform_1(%arg0: i32) -> (i32, i32, i32) {
    %c0_i32 = arith.constant 0 : i32
    %c0_i32_0 = arith.constant 0 : i32
    %c0_i32_1 = arith.constant 0 : i32
    return %arg0, %c0_i32, %c0_i32_0 : i32, i32, i32
  }
  func.func @transform_2(%arg0: i32) -> (i32, i32, i32) {
    %c0_i32 = arith.constant 0 : i32
    %c0_i32_0 = arith.constant 0 : i32
    %c0_i32_1 = arith.constant 0 : i32
    %c0_i32_2 = arith.constant 0 : i32
    return %c0_i32, %c0_i32_0, %c0_i32_1 : i32, i32, i32
  }
  func.func @transform_3(%arg0: i32) -> (i32, i32) {
    %c0_i32 = arith.constant 0 : i32
    %c0_i32_0 = arith.constant 0 : i32
    %c0_i32_1 = arith.constant 0 : i32
    return %c0_i32, %c0_i32_0 : i32, i32
  }
  func.func @transform_4(%arg0: i32) -> (i32, i32) {
    %c0_i32 = arith.constant 0 : i32
    %c0_i32_0 = arith.constant 0 : i32
    return %arg0, %c0_i32 : i32, i32
  }
}

</mosaic_0001>

<bundles_post_ra>
// kernel: tpu_custom_call.1
= control target key start
LH: loop header
LB: loop body
LE: loop exit
PB: predicated region body
PF: predicated region fallthrough
CT: control target
= control target key end

     0   :  { %9 = vsyncpa [#allocation3], 0  ;;  %s1422_s0 = inlined_call_operand.vmem [shape: f32[2,8,1], index: 0, kind: input, shape index: {}]   ;;  %s1423_s1 = inlined_call_operand.vmem [shape: f32[2,56,8], index: 1, kind: input, shape index: {}]   ;;  %s1424_s2 = inlined_call_operand.hbm [shape: f32[7,32,32], index: 2, kind: input, shape index: {}]   ;;  %s1425_s3 = inlined_call_operand.vmem [shape: f32[40,32], index: 3, kind: input, shape index: {}]   ;;  %s1426_s4 = inlined_call_operand.hbm [shape: f32[16,128], index: 4, kind: output, shape index: {}]  }
   0x1   :  { %10 = vsyncpa [#allocation4], 0 }
   0x2   :  { %12 = vsyncpa [#allocation4 + $0x1], 0  ;;  %s1159_s15 = smov 0   ;;  %s1161_s16 = smov 0  }
   0x3   :  { %s1163_s17 = smov 0   ;;  %s1165_s18 = smov 0  }
   0x4 LB: > { %s1180_s19 = sadd.s32 4294967295, %s1128_s18   ;;  %s923_s20 = sadd.s32 4294967294, %s1128_s18   ;;  %s1128_s18 = sphi %s1165_s18, %s1432_s18   ;;  %s1124_s17 = sphi %s1163_s17, %s1431_s17   ;;  %s1120_s16 = sphi %s1161_s16, %s1430_s16   ;;  %s1116_s15 = sphi %s1159_s15, %s1429_s15  }
   0x5   : > { %s1184_s21 = sadd.s32 1, %s1128_s18   ;;  %s119_s22 = sadd.s32 1, %s1124_s17 }
   0x6   : > { %s116_s23 = ssub.s32 %s1128_s18, %s1184_s21  ;;  %p129_p0 = scmp.ne.s32.totalorder %s1124_s17, %s1120_s16 }
   0x7   : > { %p117_p1 = scmp.eq.s32.totalorder %s116_s23, 0  ;;  %p130_p2 = scmp.eq.s32.totalorder %s1180_s19, 1 }
   0x8   : > { %p135_p3 = scmp.ne.s32.totalorder %s1120_s16, %s1116_s15  ;;  %p136_p4 = scmp.eq.s32.totalorder %s923_s20, 1 }
   0x9   : > { %s1195_s24 = scalar_select %p117_p1, %s1124_s17, %s119_s22  }
   0xa   : > { %p1197_p5 = por %p130_p2, %p129_p0  ;;  %p1201_p6 = por %p136_p4, %p135_p3 }
   0xb   : > { %p924_p7 = scmp.ge.s32.totalorder %s1128_s18, 1  ;;  %p143_p8 = scmp.lt.s32.totalorder %s1128_s18, 3 }
   0xc   : > { %p981_p9 = scmp.eq.s32.totalorder %s1180_s19, 0  ;;  %s154_s29 = sshll.u32 %s1424_s2, 4  ;;  %s155_s29 = int_to_ptr.hbm [resolvable:$true] %s154_s29 }
   0xd   : > { %p144_p10 = pnand %p924_p7, %p143_p8  ;;  %s1130_s30 = smov [#allocation2]  }
   0xe   : > { %s156_s5 = sshll.u32 %s1130_s30, 4  ;;  %s1131_s6 = smov 128   ;;  %s157_s5 = int_to_ptr.vmem [resolvable:$true] %s156_s5 }
   0xf   : > { %p973_p11 = pneg %p144_p10  ;;  %s1132_s7 = smov 8  }
  0x10   : > { %190 = sbr.rel (%p144_p10) target bundleno = 1202 (0x4b2), region = 36 }
  0x11   : > { %p974_p12 = pnand %p981_p9, %p973_p11 }
  0x13   : > { %976 = dma.hbm_to_vmem [thread:$0]  (!%p974_p12), %s155_s29, 3584, %s157_s5, [#allocation3], %s1131_s6, %s1131_s6, %s1132_s7  }
  0x15   : > { %1107 = dma.done.wait (%p981_p9), [#allocation3], 3584  }
  0x16   : > { %1109 = vsyncadd (%p981_p9), [#allocation3], 4294963712  ;;  %p221_p13 = scmp.lt.s32.totalorder %s1180_s19, 1  ;;  %v1133_v0 = vmov 0   ;;  %v1022_v2 = vld [vmem:[%s1425_s3 + $0x20] ss:$0 sm:$0xff] }
  0x17   : > { %1020 = vset.pattern.permute.xlu0 %v1133_v0  ;;  %1021 = vset.pattern.permute.xlu1 %v1133_v0  ;;  %v1023_v3 = vld [vmem:[%s1425_s3 + $0x21] ss:$0 sm:$0xff]  ;;  %vm285_vm0 = vcmask 64512   ;;  %v1243_v10 = vld [vmem:[#allocation2 + $0x98] sm:$0xff]  ;;  %v1247_v12 = vld [vmem:[#allocation2 + $0x10] sm:$0xff]  ;;  %vm345_vm1 = vcmask 261120  }
  0x18   : > { %s222_s8 = scalar_select %p221_p13, %s1180_s19, 1  ;;  %v1245_v11 = vld [vmem:[#allocation2 + $0x18] sm:$0xff]  ;;  %v1251_v13 = vld [vmem:[#allocation2 + $0x8] sm:$0xff]  ;;  %v257_v18 = vld [vmem:[#allocation2] sm:$0xff]  ;;  %vm740_vm2 = vcmask 257024   ;;  %vm758_vm3 = vcmask 1041409  }
  0x19   : > { %361 = vmatpush.msra.mxu1 %v1245_v11  ;;  %v264_v19 = vld [vmem:[#allocation2 + $0x38] sm:$0xff]  ;;  %v1271_v20 = vld [vmem:[#allocation2 + $0x90] sm:$0xff]  ;;  %v262_v22 = vld [vmem:[#allocation2 + $0x28] sm:$0xff]  ;;  %vm785_vm4 = vcmask 254976   ;;  %vm810_vm8 = vcmask 1024   ;;  %s963_s5 = sshll.u32 %s1180_s19, 3 }
  0x1a   : > { %s930_s9 = sshll.u32 %s222_s8, 3  ;;  %s966_s13 = smul.u32 56, %s222_s8  ;;  %v263_v21 = vld [vmem:[#allocation2 + $0x30] sm:$0xff]  ;;  %384 = vmatpush.msra.mxu3 %v264_v19  ;;  %v261_v23 = vld [vmem:[#allocation2 + $0x20] sm:$0xff]  ;;  %v268_v24 = vld [vmem:[#allocation2 + $0x58] sm:$0xff] }
  0x1b   : > { %s224_s12 = scalar_lea.vmem %s1422_s0, %s930_s9  ;;  %362 = vmatpush.msra.mxu1 %v1247_v12  ;;  %v267_v25 = vld [vmem:[#allocation2 + $0x50] sm:$0xff]  ;;  %v266_v26 = vld [vmem:[#allocation2 + $0x48] sm:$0xff]  ;;  %v265_v27 = vld [vmem:[#allocation2 + $0x40] sm:$0xff]  ;;  %s835_s8 = scalar_lea.hbm %s1426_s4, %s963_s5 }
  0x1c   : > { %v240_v1 = vld [vmem:[%s224_s12] sm:$0xff]  ;;  %s229_s29 = scalar_lea.vmem %s1423_s1, %s966_s13  ;;  %385 = vmatpush.msra.mxu3 %v263_v21  ;;  %v1274_v28 = vld [vmem:[#allocation2 + $0x88] sm:$0xff]  ;;  %v272_v29 = vld [vmem:[#allocation2 + $0x78] sm:$0xff]  ;;  %s839_s11 = sshll.u32 %s835_s8, 4  ;;  %s840_s11 = int_to_ptr.hbm [resolvable:$true] %s839_s11 }
  0x1d   : > { %243 = vperm.xlu0 %1020, %v240_v1   ;;  %v1231_v7 = vld [vmem:[%s229_s29] sm:$0xff]  ;;  %v1235_v8 = vld [vmem:[%s229_s29 + $0x8] sm:$0xff]  ;;  %v1239_v9 = vld [vmem:[%s229_s29 + $0x10] sm:$0xff]  ;;  %363 = vmatpush.msra.mxu1 %v1251_v13  ;;  %s1076_s13 = sshra.s32 %s840_s11, 4  ;;  %s1082_s22 = scalar_lea.hbm %s1426_s4, 16  ;;  %s1077_s13 = int_to_ptr.hbm [resolvable:$true] %s1076_s13 }
  0x1e   : > { %v1254_v14 = vld [vmem:[%s229_s29 + $0x18] sm:$0xff]  ;;  %v1259_v15 = vld [vmem:[%s229_s29 + $0x20] sm:$0xff]  ;;  %v1263_v16 = vld [vmem:[%s229_s29 + $0x28] sm:$0xff]  ;;  %386 = vmatpush.msra.mxu3 %v262_v22  ;;  %s1078_s14 = scalar_lea.hbm %s1077_s13, 8  ;;  %p1083_p3 = scmp.lt.s32.totalorder %s1077_s13, %s1426_s4 }
  0x1f   : > { %v1267_v17 = vld [vmem:[%s229_s29 + $0x30] sm:$0xff]  ;;  %364 = vmatpush.msra.mxu1 %v257_v18  ;;  %v270_v31 = vld [vmem:[#allocation2 + $0x68] sm:$0xff]  ;;  %v269_v32 = vld [vmem:[#allocation2 + $0x60] sm:$0xff]  ;;  %s218_s29 = sand.u32 1, %s1120_s16   ;;  %p1079_p0 = scmp.ne.s32.totalorder %s1077_s13, %s1078_s14 }
  0x20   : > { %387 = vmatpush.msra.mxu3 %v261_v23  ;;  %v271_v30 = vld [vmem:[#allocation2 + $0x70] sm:$0xff]  ;;  %v1277_v33 = vld [vmem:[#allocation2 + $0x80] sm:$0xff]  ;;  %v1281_v35 = vld [vmem:[#allocation2 + $0xb8] sm:$0xff]  ;;  %s929_s30 = sshll.u32 %s218_s29, 3  ;;  %s825_s12 = scalar_lea.sflag [#allocation4], %s218_s29 }
  0x21   : > { %430 = vmatpush.msrb.mxu1 %v272_v29  ;;  %v1284_v37 = vld [vmem:[#allocation2 + $0xb0] sm:$0xff]  ;;  %v1286_v38 = vld [vmem:[#allocation2 + $0xd8] sm:$0xff]  ;;  %v1292_v40 = vld [vmem:[#allocation2 + $0xa8] sm:$0xff]  ;;  %s220_s9 = scalar_lea.vmem [#allocation5], %s929_s30  ;;  %p1080_p1 = pnand %p1079_p0, %p1197_p5 }
  0x22   : > { %407 = vmatpush.msrb.mxu3 %v268_v24  ;;  %v1288_v39 = vld [vmem:[#allocation2 + $0xd0] sm:$0xff]  ;;  %v1294_v41 = vld [vmem:[#allocation2 + $0xc8] sm:$0xff]  ;;  %v1298_v42 = vld [vmem:[#allocation2 + $0xa0] sm:$0xff]  ;;  %s837_s10 = sshll.u32 %s220_s9, 4  ;;  %p1084_p4 = scmp.lt.s32.totalorder %s1082_s22, %s1078_s14  ;;  %s838_s10 = int_to_ptr.vmem [resolvable:$true] %s837_s10 }
  0x23   : > { %431 = vmatpush.msrb.mxu1 %v271_v30  ;;  %v1300_v43 = vld [vmem:[#allocation2 + $0xc0] sm:$0xff]  ;;  %p1081_p2 = pneg %p1080_p1 }
  0x24   : > { %408 = vmatpush.msrb.mxu3 %v267_v25  ;;  %p1085_p7 = por %p1084_p4, %p1083_p3 }
  0x25   : > { %432 = vmatpush.msrb.mxu1 %v270_v31 }
  0x26   : > { %409 = vmatpush.msrb.mxu3 %v266_v26  ;;  %p1086_p8 = pnand %p1085_p7, %p1081_p2 }
  0x27   : > { %433 = vmatpush.msrb.mxu1 %v269_v32 }
  0x28   : > { %410 = vmatpush.msrb.mxu3 %v265_v27 }
  0x8f   : > { %v244_v4 = vpop.permute.xlu0 %243 }
  0x90   : > { %v247_v5 = vmul.f32 %v1022_v2, %v244_v4 }
  0x92   : > { %v249_v6 = vadd.f32 %v1023_v3, %v247_v5  ;;  %v1323_v3 = vld [vmem:[%s1425_s3 + $0x22] ss:$0 sm:$0xff] }
  0x94   : > { %322 = vmatpush.msra.mxu0 %v249_v6 }
  0x95   : > { %932 = vmatmul.msk.f32.vlgmr.msra.gmra.mxu0 %vm285_vm0, %v1231_v7 }
  0x96   : > { %453 = vmatpush.msrb.mxu0 %v1243_v10 }
  0x98   : > { %454 = vmatpush.msrb.mxu0 %v1271_v20 }
  0x9a   : > { %455 = vmatpush.msrb.mxu0 %v1274_v28 }
  0x9c   : > { %456 = vmatpush.msrb.mxu0 %v1277_v33 }
  0x9d   : > { %933 = vmatmul.msk.f32.gmra.mxu0 %vm285_vm0, %v1235_v8 }
  0xa5   : > { %934 = vmatmul.msk.f32.gmra.mxu0 %vm285_vm0, %v1239_v9 }
  0xad   : > { %935 = vmatmul.msk.f32.gmra.mxu0 %vm285_vm0, %v1254_v14 }
  0xb5   : > { %936 = vmatmul.msk.f32.gmra.mxu0 %vm285_vm0, %v1259_v15 }
  0xbd   : > { %937 = vmatmul.msk.f32.gmra.mxu0 %vm285_vm0, %v1263_v16 }
  0xc5   : > { %938 = vmatmul.msk.f32.gmra.mxu0 %vm285_vm0, %v1267_v17 }
 0x112   : > { %v324_v34 = vpop.f32.mrf.mxu0 }
 0x113   : > { %939 = vmatmul.msk.f32.vlgmr.msra.gmra.mxu1 %vm345_vm1, %v324_v34 }
 0x114   : > { %499 = vmatpush.msra.mxu1 %v1286_v38 }
 0x116   : > { %500 = vmatpush.msra.mxu1 %v1288_v39 }
 0x118   : > { %501 = vmatpush.msra.mxu1 %v1294_v41 }
 0x11a   : > { %v327_v36 = vpop.f32.mrf.mxu0  ;;  %502 = vmatpush.msra.mxu1 %v1300_v43 }
 0x11b   : > { %940 = vmatmul.msk.f32.vlgmr.msra.gmra.mxu3 %vm345_vm1, %v327_v36 }
 0x11c   : > { %476 = vmatpush.msra.mxu3 %v1281_v35 }
 0x11e   : > { %477 = vmatpush.msra.mxu3 %v1284_v37 }
 0x120   : > { %478 = vmatpush.msra.mxu3 %v1292_v40 }
 0x122   : > { %v330_v44 = vpop.f32.mrf.mxu0  ;;  %479 = vmatpush.msra.mxu3 %v1298_v42 }
 0x123   : > { %941 = vmatmul.msk.f32.vlgmr.msrb.gmra.mxu3 %vm345_vm1, %v330_v44 }
 0x124   : > { %576 = vmatpush.msrb.mxu3 %v1245_v11 }
 0x126   : > { %577 = vmatpush.msrb.mxu3 %v1247_v12 }
 0x128   : > { %578 = vmatpush.msrb.mxu3 %v1251_v13 }
 0x12a   : > { %v333_v45 = vpop.f32.mrf.mxu0  ;;  %579 = vmatpush.msrb.mxu3 %v257_v18  ;;  %v233_v18 = vld [vmem:[%s1425_s3 + $0x18] sm:$0xff] }
 0x12b   : > { %942 = vmatmul.msk.f32.vlgmr.msrb.gmra.mxu1 %vm345_vm1, %v333_v45 }
 0x12c   : > { %599 = vmatpush.msrb.mxu1 %v264_v19 }
 0x12e   : > { %600 = vmatpush.msrb.mxu1 %v263_v21 }
 0x130   : > { %601 = vmatpush.msrb.mxu1 %v262_v22  ;;  %v231_v22 = vld [vmem:[%s1425_s3 + $0x8] sm:$0xff] }
 0x132   : > { %v336_v46 = vpop.f32.mrf.mxu0  ;;  %602 = vmatpush.msrb.mxu1 %v261_v23 }
 0x133   : > { %943 = vmatmul.msk.f32.vlgmr.msrb.gmra.mxu0 %vm345_vm1, %v336_v46 }
 0x13a   : > { %v339_v47 = vpop.f32.mrf.mxu0 }
 0x13b   : > { %944 = vmatmul.msk.f32.vlgmr.msra.gmra.mxu3 %vm345_vm1, %v339_v47 }
 0x13c   : > { %622 = vmatpush.msra.mxu3 %v268_v24 }
 0x13e   : > { %623 = vmatpush.msra.mxu3 %v267_v25 }
 0x140   : > { %624 = vmatpush.msra.mxu3 %v266_v26  ;;  %v230_v26 = vld [vmem:[%s1425_s3] sm:$0xff] }
 0x142   : > { %v342_v48 = vpop.f32.mrf.mxu0  ;;  %625 = vmatpush.msra.mxu3 %v265_v27 }
 0x143   : > { %945 = vmatmul.msk.f32.vlgmr.msra.gmra.mxu1 %vm345_vm1, %v342_v48 }
 0x144   : > { %645 = vmatpush.msra.mxu1 %v272_v29 }
 0x146   : > { %646 = vmatpush.msra.mxu1 %v271_v30 }
 0x148   : > { %647 = vmatpush.msra.mxu1 %v270_v31 }
 0x14a   : > { %648 = vmatpush.msra.mxu1 %v269_v32 }
 0x190   : > { %v366_v50 = vpop.f32.mrf.mxu1 }
 0x191   : > { %v507_v53 = vsel %vm345_vm1, %v366_v50, 0.0 }
 0x19e   : > { %v389_v49 = vpop.f32.mrf.mxu3 }
 0x19f   : > { %v508_v52 = vsel %vm345_vm1, %v389_v49, 0.0 }
 0x1a0   : > { %v509_v55 = vadd.f32 %v508_v52, %v507_v53 }
 0x1a6   : > { %v412_v51 = vpop.f32.mrf.mxu3 }
 0x1a7   : > { %v510_v54 = vsel %vm345_vm1, %v412_v51, 0.0 }
 0x1a8   : > { %v435_v56 = vpop.f32.mrf.mxu1  ;;  %v511_v57 = vadd.f32 %v510_v54, %v509_v55 }
 0x1a9   : > { %v512_v59 = vsel %vm345_vm1, %v435_v56, 0.0 }
 0x1aa   : > { %v513_v61 = vadd.f32 %v512_v59, %v511_v57  ;;  %v1025_v57 = vld [vmem:[%s1425_s3 + $0x23] ss:$0 sm:$0xff] }
 0x1b0   : > { %v458_v58 = vpop.f32.mrf.mxu0 }
 0x1b1   : > { %v514_v60 = vsel %vm345_vm1, %v458_v58, 0.0 }
 0x1b2   : > { %v515_v62 = vadd.f32 %v514_v60, %v513_v61  ;;  %v1026_v60 = vld [vmem:[%s1425_s3 + $0x24] ss:$0 sm:$0xff] }
 0x1be   : > { %v481_v63 = vpop.f32.mrf.mxu3 }
 0x1bf   : > { %v516_v0 = vsel %vm345_vm1, %v481_v63, 0.0 }
 0x1c0   : > { %v517_v1 = vadd.f32 %v516_v0, %v515_v62  ;;  %v504_v2 = vpop.f32.mrf.mxu1  ;;  %v1027_v0 = vld [vmem:[%s1425_s3 + $0x25] ss:$0 sm:$0xff] }
 0x1c1   : > { %v518_v4 = vsel %vm345_vm1, %v504_v2, 0.0 }
 0x1c2   : > { %v519_v5 = vadd.f32 %v518_v4, %v517_v1 }
 0x1c4   : > { %v521_v6 = vadd.f32 %v1323_v3, %v519_v5 }
 0x1c6   : > { %v522_v11 = vmax.f32 %v521_v6, 0.0 }
 0x1c8   : > { %538 = vmatpush.msra.mxu2 %v522_v11 }
 0x1c9   : > { %946 = vmatmul.msk.f32.vlgmr.msra.gmra.mxu2 %vm285_vm0, %v1231_v7 }
 0x1d1   : > { %947 = vmatmul.msk.f32.gmra.mxu2 %vm285_vm0, %v1235_v8 }
 0x1d9   : > { %948 = vmatmul.msk.f32.gmra.mxu2 %vm285_vm0, %v1239_v9 }
 0x1e1   : > { %949 = vmatmul.msk.f32.gmra.mxu2 %vm285_vm0, %v1254_v14 }
 0x1e9   : > { %950 = vmatmul.msk.f32.gmra.mxu2 %vm285_vm0, %v1259_v15 }
 0x1f1   : > { %951 = vmatmul.msk.f32.gmra.mxu2 %vm285_vm0, %v1263_v16 }
 0x1f9   : > { %952 = vmatmul.msk.f32.gmra.mxu2 %vm285_vm0, %v1267_v17 }
 0x24c   : > { %v540_v12 = vpop.f32.mrf.mxu2 }
 0x24d   : > { %953 = vmatmul.msk.f32.vlgmr.msrb.gmra.mxu3 %vm345_vm1, %v540_v12 }
 0x24e   : > { %668 = vmatpush.msrb.mxu3 %v1243_v10 }
 0x250   : > { %669 = vmatpush.msrb.mxu3 %v1271_v20  ;;  %v232_v20 = vld [vmem:[%s1425_s3 + $0x10] sm:$0xff] }
 0x252   : > { %670 = vmatpush.msrb.mxu3 %v1274_v28 }
 0x254   : > { %v543_v7 = vpop.f32.mrf.mxu2  ;;  %671 = vmatpush.msrb.mxu3 %v1277_v33 }
 0x255   : > { %954 = vmatmul.msk.f32.vlgmr.msrb.gmra.mxu1 %vm345_vm1, %v543_v7 }
 0x256   : > { %691 = vmatpush.msrb.mxu1 %v1281_v35 }
 0x258   : > { %692 = vmatpush.msrb.mxu1 %v1284_v37 }
 0x25a   : > { %693 = vmatpush.msrb.mxu1 %v1292_v40 }
 0x25c   : > { %v546_v8 = vpop.f32.mrf.mxu2  ;;  %694 = vmatpush.msrb.mxu1 %v1298_v42 }
 0x25d   : > { %955 = vmatmul.msk.f32.vlgmr.msra.gmra.mxu3 %vm345_vm1, %v546_v8 }
 0x25e   : > { %714 = vmatpush.msra.mxu3 %v1286_v38 }
 0x260   : > { %715 = vmatpush.msra.mxu3 %v1288_v39 }
 0x262   : > { %716 = vmatpush.msra.mxu3 %v1294_v41 }
 0x264   : > { %v549_v9 = vpop.f32.mrf.mxu2  ;;  %717 = vmatpush.msra.mxu3 %v1300_v43 }
 0x265   : > { %956 = vmatmul.msk.f32.vlgmr.msra.gmra.mxu1 %vm345_vm1, %v549_v9 }
 0x266   : > { %774 = vmatpush.msra.mxu1 %v233_v18 }
 0x268   : > { %775 = vmatpush.msra.mxu1 %v232_v20 }
 0x26a   : > { %776 = vmatpush.msra.mxu1 %v231_v22 }
 0x26c   : > { %v552_v10 = vpop.f32.mrf.mxu2  ;;  %777 = vmatpush.msra.mxu1 %v230_v26 }
 0x26d   : > { %957 = vmatmul.msk.f32.vlgmr.msrb.gmra.mxu3 %vm345_vm1, %v552_v10 }
 0x274   : > { %v555_v13 = vpop.f32.mrf.mxu2 }
 0x275   : > { %958 = vmatmul.msk.f32.vlgmr.msrb.gmra.mxu1 %vm345_vm1, %v555_v13 }
 0x27c   : > { %v558_v14 = vpop.f32.mrf.mxu2 }
 0x27d   : > { %959 = vmatmul.msk.f32.vlgmr.msra.gmra.mxu3 %vm345_vm1, %v558_v14 }
 0x2d0   : > { %v581_v15 = vpop.f32.mrf.mxu3 }
 0x2d1   : > { %v722_v23 = vsel %vm345_vm1, %v581_v15, 0.0 }
 0x2d2   : > { %v604_v16 = vpop.f32.mrf.mxu1 }
 0x2d3   : > { %v723_v19 = vsel %vm345_vm1, %v604_v16, 0.0 }
 0x2d4   : > { %v724_v25 = vadd.f32 %v723_v19, %v722_v23 }
 0x2e0   : > { %v627_v17 = vpop.f32.mrf.mxu3 }
 0x2e1   : > { %v725_v24 = vsel %vm345_vm1, %v627_v17, 0.0 }
 0x2e2   : > { %v650_v21 = vpop.f32.mrf.mxu1  ;;  %v726_v27 = vadd.f32 %v725_v24, %v724_v25 }
 0x2e3   : > { %v727_v29 = vsel %vm345_vm1, %v650_v21, 0.0 }
 0x2e4   : > { %v728_v31 = vadd.f32 %v727_v29, %v726_v27 }
 0x2f0   : > { %v673_v28 = vpop.f32.mrf.mxu3 }
 0x2f1   : > { %v729_v30 = vsel %vm345_vm1, %v673_v28, 0.0 }
 0x2f2   : > { %v696_v32 = vpop.f32.mrf.mxu1  ;;  %v730_v33 = vadd.f32 %v729_v30, %v728_v31 }
 0x2f3   : > { %v731_v34 = vsel %vm345_vm1, %v696_v32, 0.0 }
 0x2f4   : > { %v732_v35 = vadd.f32 %v731_v34, %v730_v33 }
 0x300   : > { %v719_v36 = vpop.f32.mrf.mxu3 }
 0x301   : > { %v733_v37 = vsel %vm345_vm1, %v719_v36, 0.0 }
 0x302   : > { %v734_v38 = vadd.f32 %v733_v37, %v732_v35 }
 0x304   : > { %v735_v39 = vadd.f32 %v1323_v3, %v734_v38 }
 0x306   : > { %v736_v40 = vmax.f32 %v735_v39, 0.0 }
 0x308   : > { %v738_v41 = vrot.slane %v736_v40, 4  ;;  %v741_v42 = vsel %vm740_vm2, %v736_v40, -inf }
 0x309   : > { %v742_v43 = vrot.slane %v741_v42, 4 }
 0x30a   : > { %v748_v44 = vsel %vm740_vm2, %v738_v41, -inf }
 0x30b   : > { %v743_v45 = vmax.f32 %v741_v42, %v742_v43  ;;  %v749_v46 = vrot.slane %v748_v44, 4 }
 0x30d   : > { %v744_v47 = vrot.slane %v743_v45, 2  ;;  %v750_v48 = vmax.f32 %v748_v44, %v749_v46 }
 0x30f   : > { %v745_v49 = vmax.f32 %v743_v45, %v744_v47  ;;  %v751_v50 = vrot.slane %v750_v48, 2 }
 0x311   : > { %v746_v51 = vrot.slane %v745_v49, 1  ;;  %v752_v52 = vmax.f32 %v750_v48, %v751_v50 }
 0x313   : > { %v753_v53 = vrot.slane %v752_v52, 1  ;;  %v747_v54 = vmax.f32 %v745_v49, %v746_v51 }
 0x315   : > { %v754_v55 = vmax.f32 %v752_v52, %v753_v53 }
 0x317   : > { %v759_v56 = vsel %vm758_vm3, %v754_v55, %v747_v54 }
 0x318   : > { %960 = vmatmul.msk.f32.vlgmr.msra.gmra.mxu1 %vm345_vm1, %v759_v56 }
 0x395   : > { %v779_v58 = vpop.f32.mrf.mxu1 }
 0x396   : > { %v780_v59 = vadd.f32 %v1025_v57, %v779_v58 }
 0x398   : > { %v782_v61 = vmax.f32 %v780_v59, 0.0 }
 0x39a   : > { %v784_v62 = vmul.f32 %v1026_v60, %v782_v61 }
 0x39c   : > { %v786_v63 = vsel %vm785_vm4, %v784_v62, 0.0 }
 0x39d   : > { %787 = vadd.xlane.f32.xlu0 %v786_v63 }
 0x410   : > { %v788_v1 = vpop.xlane.xlu0 %787 }
 0x411   : > { %v790_v2 = vadd.f32 %v1027_v0, %v788_v1 }
 0x413   : > { %v961_v3 = vmul.f32 -1.442695, %v790_v2 }
 0x415   : > { %1028 = vpow2.f32 %v961_v3 }
 0x41b   : > { %v1029_v4 = vpop.eup %1028 }
 0x41c   : > { %v794_v5 = vadd.f32 1.0, %v1029_v4 }
 0x41e   : > { %1030 = vrcp.f32 %v794_v5  ;;  %v806_v7 = vand.u32 2147483648, %v794_v5  ;;  %v804_v9 = vand.u32 2147483647, %v794_v5  ;;  %vm800_vm6 = vweird.f32 %v794_v5 }
 0x420   : > { %v807_v13 = vor.u32 1.1754944e-38, %v806_v7  ;;  %vm805_vm9 = vcmp.eq.f32.partialorder %v804_v9, 8.507059e+37 }
 0x424   : > { %v1031_v6 = vpop.eup %1030 }
 0x425   : > { %v796_v11 = vmul.f32 %v1031_v6, %v794_v5  ;;  %vm801_vm5 = vweird.f32 %v1031_v6 }
 0x426   : > { %vm802_vm7 = vmor %vm800_vm6, %vm801_vm5 }
 0x427   : > { %v797_v12 = vsub.f32 1.0, %v796_v11 }
 0x429   : > { %v798_v8 = vmul.f32 %v1031_v6, %v797_v12 }
 0x42b   : > { %v799_v10 = vadd.f32 %v1031_v6, %v798_v8 }
 0x42d   : > { %v803_v14 = vsel %vm802_vm7, %v1031_v6, %v799_v10 }
 0x42e   : > { %v808_v15 = vsel %vm805_vm9, %v807_v13, %v803_v14 }
 0x42f   : > { %v811_v16 = vsel %vm810_vm8, %v808_v15, 0.0 }
 0x430   : > { %v812_v17 = vrot.slane %v811_v16, 4 }
 0x432   : > { %v813_v18 = vadd.f32 %v812_v17, %v811_v16 }
 0x434   : > { %v814_v19 = vrot.slane %v813_v18, 2 }
 0x436   : > { %v815_v20 = vadd.f32 %v814_v19, %v813_v18 }
 0x438   : > { %v816_v21 = vrot.slane %v815_v20, 1 }
 0x43a   : > { %v817_v22 = vadd.f32 %v816_v21, %v815_v20 }
 0x43c   : > { %820 = vperm.xlu1 %1021, %v817_v22  }
 0x4ae   : > { %v821_v23 = vpop.permute.xlu1 %820 }
 0x4af   : > { %823 = vst [vmem:[%s220_s9] sm:$0xff] %v821_v23 }
 0x4b0   : > { %1089 = shalt.err (!%p1086_p8)
}
 0x4b1   : > { %971 = dma.vmem_to_hbm [thread:$0]  (%p1197_p5), %s838_s10, 128, %s840_s11, %s825_s12  }
 0x4b2 PF: > { %p983_p9 = scmp.ge.s32.totalorder %s1128_s18, 2  ;;  %s851_s28 = sand.u32 1, %s1116_s15  }
 0x4b3   : > { %s852_s29 = scalar_lea.sflag [#allocation4], %s851_s28 }
 0x4b4   : > { %p978_p10 = pnand %p983_p9, %p1201_p6 }
 0x4b6   : > { %p979_p11 = pneg %p978_p10 }
 0x4b8   : > { %1111 = dma.done.wait (%p979_p11), %s852_s29, 128  }
 0x4b9   : > { %1113 = vsyncadd (%p979_p11), %s852_s29, 4294967168  ;;  %p15_p12 = scmp.ge.s32.totalorder %s1184_s21, 4   ;;  %s1429_s15 = smov %s1120_s16 }
 0x4ba   : > { %s1430_s16 = smov %s1124_s17  ;;  %s1431_s17 = smov %s1195_s24 }
 0x4bb   : > { %s1432_s18 = smov %s1184_s21  ;;  %17 = sbr.rel (!%p15_p12) target bundleno = 4 (0x4), region = 79 }
 0x4c0   :  { %858 = vsyncpa [#allocation3], 1 }
 0x4c1   :  { %860 = vsyncpa [#allocation3 + $0x1], 1 }
 0x4c2   :  { %861 = vsyncpa [#allocation4], 1 }
 0x4c3   :  { %863 = vsyncpa [#allocation4 + $0x1], 1 }

</bundles_post_ra>
